<compile_context>
chip_gen: v6e
topology: v6e:2x2x1
jax: 0.10.0
libtpu: 0.0.40
codegen_flags: <defaults>
</compile_context>

<pallas_src>
import functools
import math

import jax
import jax.numpy as jnp
from jax.experimental import pallas as pl
from jax.experimental.pallas import tpu as pltpu


_LANE = 128
_VMEM_BUDGET_BYTES = 40 * 1024 * 1024   # working-set budget (fits v7x 64 MiB)
_VMEM_LIMIT_BYTES = 56 * 1024 * 1024    # explicit scoped-VMEM limit


def _round_up(x, m):
    return ((x + m - 1) // m) * m


# ----------------------------------------------------------------------------
# Weight packing: PyTorch gate order [i; f; g; o] -> lane-aligned [i | f | o | g]
# with each gate zero-padded from H to Hp (multiple of 128). Every in-kernel
# gate slice is 128-lane aligned; sigmoid covers [0:3Hp] and tanh covers
# [3Hp:4Hp] in one EUP sweep each. Padded hidden lanes stay exactly 0
# (gates=0 -> i=f=o=0.5, g=0 -> c,h stay 0), so padding never leaks.
# ----------------------------------------------------------------------------
def _pack_gate_matrix(w, hp):
    """w: (4H, K) PyTorch row blocks [i;f;g;o] -> (K, 4*hp) cols [i|f|o|g]."""
    h = w.shape[0] // 4
    wi, wf, wg, wo = w[0:h], w[h:2 * h], w[2 * h:3 * h], w[3 * h:4 * h]

    def pad_t(blk):                                       # (H, K) -> (K, hp)
        return jnp.pad(jnp.transpose(blk), ((0, 0), (0, hp - h)))

    return jnp.concatenate([pad_t(wi), pad_t(wf), pad_t(wo), pad_t(wg)], axis=1)


def _pack_gate_bias(b, hp):
    h = b.shape[0] // 4
    bi, bf, bg, bo = b[0:h], b[h:2 * h], b[2 * h:3 * h], b[3 * h:4 * h]
    pad = lambda v: jnp.pad(v, (0, hp - h))
    return jnp.concatenate([pad(bi), pad(bf), pad(bo), pad(bg)])


# ----------------------------------------------------------------------------
# Kernel 1: row-tiled matmul + bias (bf16 MXU inputs, f32 accumulation, bf16
# output). Used for the hoisted layer-0 input-gate projection (encoder folded).
# ----------------------------------------------------------------------------
def _matmul_bias_kernel(x_ref, w_ref, b_ref, o_ref):
    o_ref[...] = (jnp.dot(x_ref[...], w_ref[...],
                          preferred_element_type=jnp.float32)
                  + b_ref[...]).astype(o_ref.dtype)


def matmul_bias(x2d, w, b, *, block_m=256):
    """y = x2d @ w + b (bf16 out), tiled over rows with parallel semantics."""
    M, K = x2d.shape
    N = w.shape[1]
    bm = M if M <= block_m else block_m    # 256 % 8 == 0; bm == M is full-dim
    return pl.pallas_call(
        _matmul_bias_kernel,
        out_shape=jax.ShapeDtypeStruct((M, N), jnp.bfloat16),
        grid_spec=pltpu.PrefetchScalarGridSpec(
            num_scalar_prefetch=0, grid=(pl.cdiv(M, bm),),
            in_specs=[pl.BlockSpec((bm, K), lambda i: (i, 0)),
                      pl.BlockSpec((K, N), lambda i: (0, 0)),
                      pl.BlockSpec((1, N), lambda i: (0, 0))],
            out_specs=pl.BlockSpec((bm, N), lambda i: (i, 0))),
        compiler_params=pltpu.CompilerParams(
            dimension_semantics=("parallel",),
            vmem_limit_bytes=_VMEM_LIMIT_BYTES),
    )(x2d.astype(jnp.bfloat16), w.astype(jnp.bfloat16),
      b.reshape(1, N).astype(jnp.float32))


# ----------------------------------------------------------------------------
# Kernel 2: one LSTM layer, (batch, time)-blocked grid, fused per-step epilogue.
#
# Inputs are the PRE-COMPUTED, lane-packed input gates gx[t] (bf16), so each
# step only does h @ W_hh (bf16 MXU, f32 accum) on the serial path. The fused
# epilogue `out_t = y_t @ ew + eb` is either the next layer's input-gate
# projection or the eval-BN-folded interleaved (logit, 1-logit) head.
# h/c state is carried in the resident hn/cn output blocks.
# ----------------------------------------------------------------------------
def _lstm_layer_kernel(gx_ref, len_ref, whh_ref, ew_ref, eb_ref,
                       out_ref, hn_ref, cn_ref, *, hp, t_block, unroll):
    t_blk = pl.program_id(1)

    @pl.when(t_blk == 0)
    def _():  # hidden=None -> zero initial state per batch block
        hn_ref[...] = jnp.zeros_like(hn_ref)
        cn_ref[...] = jnp.zeros_like(cn_ref)

    bb = hn_ref.shape[0]
    n_out = eb_ref.shape[1]
    lens = len_ref[...]                    # (bb, 1) int32, read once per block
    whh = whh_ref[...]                     # (hp, 4hp) bf16, resident
    ew = ew_ref[...]                       # (hp, n_out) bf16, resident
    # Hoist the bias broadcast out of the unrolled loop (no per-step
    # broadcast_in_dim — JAX does not CSE it).
    eb = jnp.broadcast_to(eb_ref[...], (bb, n_out))
    t0 = t_blk * t_block

    def step(tt, carry):
        h, c = carry                                          # (bb, hp) f32
        gates = gx_ref[tt].astype(jnp.float32) + jnp.dot(
            h.astype(jnp.bfloat16), whh, preferred_element_type=jnp.float32)
        # Packed gate layout [i | f | o | g]: two lane-aligned EUP sweeps.
        sig = jax.nn.sigmoid(gates[:, :3 * hp])
        g_g = jnp.tanh(gates[:, 3 * hp:])
        i_g = sig[:, 0:hp]
        f_g = sig[:, hp:2 * hp]
        o_g = sig[:, 2 * hp:3 * hp]
        c_new = f_g * c + i_g * g_g
        h_new = o_g * jnp.tanh(c_new)

        valid = (t0 + tt) < lens            # (bb, 1) packed-sequence mask
        h = jnp.where(valid, h_new, h)      # freeze state past the length
        c = jnp.where(valid, c_new, c)
        y = jnp.where(valid, h_new, 0.0)    # zero padding (pad_packed)

        out_ref[tt] = (jnp.dot(y.astype(jnp.bfloat16), ew,
                               preferred_element_type=jnp.float32)
                       + eb).astype(out_ref.dtype)
        return (h, c)

    h_fin, c_fin = jax.lax.fori_loop(0, t_block, step,
                                     (hn_ref[...], cn_ref[...]),
                                     unroll=unroll)
    hn_ref[...] = h_fin      # two (bb, hp) stores per time block, not per step
    cn_ref[...] = c_fin


def lstm_layer_fused(gx, lengths_2d, whh_packed, epi_w, epi_b, *,
                     t_block, b_block, out_dtype, unroll, vmem_limit_bytes):
    """One LSTM layer over pre-computed, lane-packed input gates gx (T,B,4Hp)."""
    T, B, G = gx.shape
    hp = G // 4
    n_out = epi_w.shape[1]
    kernel = functools.partial(_lstm_layer_kernel, hp=hp, t_block=t_block,
                               unroll=unroll)
    out, hn, cn = pl.pallas_call(
        kernel,
        out_shape=(jax.ShapeDtypeStruct((T, B, n_out), out_dtype),
                   jax.ShapeDtypeStruct((B, hp), jnp.float32),
                   jax.ShapeDtypeStruct((B, hp), jnp.float32)),
        grid_spec=pltpu.PrefetchScalarGridSpec(
            num_scalar_prefetch=0,
            grid=(B // b_block, pl.cdiv(T, t_block)),
            in_specs=[
                pl.BlockSpec((t_block, b_block, G), lambda b, t: (t, b, 0)),
                pl.BlockSpec((b_block, 1), lambda b, t: (b, 0)),
                # TODO(synk): the constant-index resident operands below could
                # be single-buffered (pipeline_mode=pl.Buffered(1)) to halve
                # their VMEM on v7x; kept default-buffered (bf16 already
                # halves them) to stay on the well-trodden lowering path.
                pl.BlockSpec((hp, G), lambda b, t: (0, 0)),
                pl.BlockSpec((hp, n_out), lambda b, t: (0, 0)),
                pl.BlockSpec((1, n_out), lambda b, t: (0, 0)),
            ],
            out_specs=(
                pl.BlockSpec((t_block, b_block, n_out), lambda b, t: (t, b, 0)),
                pl.BlockSpec((b_block, hp), lambda b, t: (b, 0)),
                pl.BlockSpec((b_block, hp), lambda b, t: (b, 0)),
            )),
        compiler_params=pltpu.CompilerParams(
            dimension_semantics=("parallel", "arbitrary"),
            vmem_limit_bytes=vmem_limit_bytes),
    )(gx.astype(jnp.bfloat16),
      lengths_2d.astype(jnp.int32),
      whh_packed.astype(jnp.bfloat16),        # bf16 MXU operand (f32 accum)
      epi_w.astype(jnp.bfloat16),
      epi_b.reshape(1, n_out).astype(jnp.float32))
    return out, hn, cn


def _derive_t_block(T, bb, hp, n_out, out_bytes):
    """Largest time block whose double-buffered working set fits the budget."""
    g = 4 * hp
    fixed = 2 * (hp * g * 2 + hp * n_out * 2 + n_out * 4)   # whh/ew/eb, 2 bufs
    fixed += 2 * 2 * bb * hp * 4                            # hn/cn blocks
    per_t = 2 * bb * (g * 2 + n_out * out_bytes)            # gx + out, 2 bufs
    tb = max(1, (_VMEM_BUDGET_BYTES - fixed) // per_t)
    return int(max(1, min(T, tb, 64)))


# ----------------------------------------------------------------------------
# Full forward
# ----------------------------------------------------------------------------
def rnn_forward(params, input_sequences, input_sequences_lengths, *,
                t_block=None):
    T, B, In = input_sequences.shape
    H = params["enc_w"].shape[0]
    C = params["fc_w"].shape[0]
    n_layers = params["n_layers"]
    hp = _round_up(H, _LANE)         # lane-aligned hidden width
    G = 4 * hp
    ncp = _round_up(2 * C, _LANE)    # lane-dense head width

    # pack_padded_sequence assumes lengths <= T; clamp so a Pallas-padded
    # partial final time block can never leak into the state.
    lengths = jnp.minimum(input_sequences_lengths.astype(jnp.int32), T)
    lengths_2d = lengths.reshape(B, 1)

    # --- notes_encoder folded into LSTM layer 0's input projection (both are
    #     linear): gx0 = x @ (We^T Wih0p) + (be Wih0p + pack(bih0 + bhh0))
    wih0_p = _pack_gate_matrix(params["lstm_wih_0"], hp)            # (H, 4hp)
    w_comb = jnp.transpose(params["enc_w"]) @ wih0_p                # (In, 4hp)
    b_comb = (params["enc_b"] @ wih0_p
              + _pack_gate_bias(params["lstm_bih_0"] + params["lstm_bhh_0"],
                                hp))                                # (4hp,)
    stream = matmul_bias(input_sequences.reshape(T * B, In),
                         w_comb, b_comb).reshape(T, B, G)           # bf16

    # TODO(synk): the BN + Dropout(0.25) branch on notes_encoded is dead code in
    # the reference forward (its result is never consumed) -- skipped.

    # --- eval-mode BatchNorm folded into the interleaved (logit, 1-logit) head.
    # TODO(synk): Dropout(0.1) is stochastic/training-mode in the reference;
    # implemented as eval-mode identity for determinism.
    eps = 1e-5
    bn_scale = params["bn_gamma"] / jnp.sqrt(params["bn_var"] + eps)
    bn_shift = params["bn_beta"] - params["bn_mean"] * bn_scale
    w_fc_t = jnp.transpose(params["fc_w"])                          # (H, C)
    w_int = jnp.stack([w_fc_t, -w_fc_t], axis=-1).reshape(H, 2 * C)
    b_int = jnp.stack([params["fc_b"], 1.0 - params["fc_b"]],
                      axis=-1).reshape(2 * C)
    head_w = jnp.pad(bn_scale[:, None] * w_int,
                     ((0, hp - H), (0, ncp - 2 * C)))               # (hp, ncp)
    head_b = jnp.pad(bn_shift @ w_int + b_int, (0, ncp - 2 * C))    # (ncp,)

    # Batch block: lets v7x megacore split the embarrassingly-parallel batch
    # axis of the recurrence across its two TensorCores.
    bb = 8 if (B > 8 and B % 8 == 0) else B

    # --- LSTM layers with fused per-step epilogues.
    h_list, c_list = [], []
    for l in range(n_layers):
        last = (l == n_layers - 1)
        if last:                     # last layer -> BN-folded logits head
            ew, eb, out_dtype, n_out = head_w, head_b, jnp.float32, ncp
        else:                        # intermediate -> next layer's input gates
            wih_next = _pack_gate_matrix(params[f"lstm_wih_{l + 1}"], hp)
            ew = jnp.pad(wih_next, ((0, hp - H), (0, 0)))           # (hp, 4hp)
            eb = _pack_gate_bias(params[f"lstm_bih_{l + 1}"]
                                 + params[f"lstm_bhh_{l + 1}"], hp)
            out_dtype, n_out = jnp.bfloat16, G
        whh_p = jnp.pad(_pack_gate_matrix(params[f"lstm_whh_{l}"], hp),
                        ((0, hp - H), (0, 0)))                      # (hp, 4hp)
        out_bytes = 4 if last else 2
        tb = t_block if t_block is not None else _derive_t_block(
            T, bb, hp, n_out, out_bytes)
        tb = min(tb, T)
        stream, hn, cn = lstm_layer_fused(
            stream, lengths_2d, whh_p, ew, eb,
            t_block=tb, b_block=bb, out_dtype=out_dtype,
            unroll=min(8, tb), vmem_limit_bytes=_VMEM_LIMIT_BYTES)
        h_list.append(hn[:, :H])
        c_list.append(cn[:, :H])
    hidden = (jnp.stack(h_list, 0), jnp.stack(c_list, 0))  # (n_layers, B, H)

    # stream is (T, B, ncp) f32: lane-padded, interleaved (logit, 1-logit).
    # Reference: logits.transpose(0,1) -> stack((l, 1-l), dim=3) -> view(-1, 2)
    # TODO(synk): assumes max(lengths) == T (pad_packed_sequence would otherwise
    # shorten the padded time dimension to max(lengths)).
    # TODO(synk): the (T,B)->(B,T) transpose could be folded into the last
    # layer's writeback (batch-major out block); kept in XLA to avoid a
    # dynamic mid-dimension store on the recurrent path.
    logits = stream[:, :, :2 * C]
    logits_flatten = jnp.transpose(logits, (1, 0, 2)).reshape(-1, 2)
    return logits_flatten, hidden


# ----------------------------------------------------------------------------
# Deterministic parameter init (PyTorch-style uniform(-1/sqrt(fan_in), ...))
# ----------------------------------------------------------------------------
def init_params(key, input_size, hidden_size, num_classes, n_layers=2):
    n_keys = 2 + 4 * n_layers + 2
    keys = iter(jax.random.split(key, n_keys))

    def uni(k, shape, fan_in):
        bound = 1.0 / math.sqrt(fan_in)
        return jax.random.uniform(k, shape, jnp.float32, -bound, bound)

    p = {"n_layers": n_layers}
    p["enc_w"] = uni(next(keys), (hidden_size, input_size), input_size)
    p["enc_b"] = uni(next(keys), (hidden_size,), input_size)
    # BatchNorm1d defaults (eval-mode running stats)
    p["bn_gamma"] = jnp.ones((hidden_size,), jnp.float32)
    p["bn_beta"] = jnp.zeros((hidden_size,), jnp.float32)
    p["bn_mean"] = jnp.zeros((hidden_size,), jnp.float32)
    p["bn_var"] = jnp.ones((hidden_size,), jnp.float32)
    for l in range(n_layers):
        p[f"lstm_wih_{l}"] = uni(next(keys), (4 * hidden_size, hidden_size),
                                 hidden_size)
        p[f"lstm_whh_{l}"] = uni(next(keys), (4 * hidden_size, hidden_size),
                                 hidden_size)
        p[f"lstm_bih_{l}"] = uni(next(keys), (4 * hidden_size,), hidden_size)
        p[f"lstm_bhh_{l}"] = uni(next(keys), (4 * hidden_size,), hidden_size)
    p["fc_w"] = uni(next(keys), (num_classes, hidden_size), hidden_size)
    p["fc_b"] = uni(next(keys), (num_classes,), hidden_size)
    return p


if __name__ == "__main__":
    T, B = 8, 2
    input_size, hidden_size, num_classes, n_layers = 16, 32, 16, 2

    key = jax.random.PRNGKey(0)
    pkey, xkey = jax.random.split(key)
    params = init_params(pkey, input_size, hidden_size, num_classes, n_layers)

    x = jax.random.normal(xkey, (T, B, input_size), jnp.float32)
    # pack_padded_sequence requires descending lengths
    lengths = jnp.array([8, 5], dtype=jnp.int32)

    logits_flatten, (h_n, c_n) = rnn_forward(params, x, lengths)
    jax.block_until_ready((logits_flatten, h_n, c_n))

    assert logits_flatten.shape == (B * T * num_classes, 2)
    assert h_n.shape == (n_layers, B, hidden_size)
    assert c_n.shape == (n_layers, B, hidden_size)
    assert bool(jnp.isfinite(logits_flatten).all())
    print("KERNEL_OK")
</pallas_src>

<mosaic_0001>
module attributes {stable_mosaic.version = 11 : i64} {
  func.func @_matmul_bias_kernel(%arg0: i32, %arg1: memref<16x16xbf16, #tpu.memory_space<vmem>>, %arg2: memref<16x512xbf16, #tpu.memory_space<vmem>>, %arg3: memref<1x512xf32, #tpu.memory_space<vmem>>, %arg4: memref<16x512xbf16, #tpu.memory_space<vmem>>) attributes {dimension_semantics = [#tpu.dimension_semantics<parallel>], iteration_bounds = array<i64: 1>, scalar_prefetch = 0 : i64, scratch_operands = 0 : i64, tpu.core_type = #tpu.core_type<tc>, window_params = [{transform_indices = @transform_0, window_bounds = array<i64: 16, 16>}, {pipeline_mode = #tpu.pipeline_mode<synchronous>, transform_indices = @transform_1, window_bounds = array<i64: 16, 512>}, {pipeline_mode = #tpu.pipeline_mode<synchronous>, transform_indices = @transform_2, window_bounds = array<i64: 1, 512>}, {transform_indices = @transform_3, window_bounds = array<i64: 16, 512>}]} {
    %c0 = arith.constant 0 : index
    %c0_0 = arith.constant 0 : index
    %0 = vector.load %arg1[%c0, %c0_0] : memref<16x16xbf16, #tpu.memory_space<vmem>>, vector<16x16xbf16>
    %c0_1 = arith.constant 0 : index
    %c0_2 = arith.constant 0 : index
    %1 = vector.load %arg2[%c0_1, %c0_2] : memref<16x512xbf16, #tpu.memory_space<vmem>>, vector<16x512xbf16>
    %cst = arith.constant dense<0.000000e+00> : vector<16x512xf32>
    %2 = tpu.matmul %0, %1, %cst {dimension_numbers = #tpu.dot_dimension_numbers<[1], [0], [0], [1], [0, 0, 1, 1], [], []>} : vector<16x16xbf16>, vector<16x512xbf16>, vector<16x512xf32> -> vector<16x512xf32>
    %c0_3 = arith.constant 0 : index
    %c0_4 = arith.constant 0 : index
    %3 = vector.load %arg3[%c0_3, %c0_4] : memref<1x512xf32, #tpu.memory_space<vmem>>, vector<1x512xf32>
    %4 = vector.broadcast %3 : vector<1x512xf32> to vector<16x512xf32>
    %5 = arith.addf %2, %4 : vector<16x512xf32>
    %6 = arith.truncf %5 : vector<16x512xf32> to vector<16x512xbf16>
    %c0_5 = arith.constant 0 : index
    %c0_6 = arith.constant 0 : index
    %7 = vector.load %arg4[%c0_5, %c0_6] : memref<16x512xbf16, #tpu.memory_space<vmem>>, vector<16x512xbf16>
    tpu.vector_store %arg4[%c0_5, %c0_6], %6 {strides = array<i32>} : memref<16x512xbf16, #tpu.memory_space<vmem>>, vector<16x512xbf16>,
    return
  }
  func.func @transform_0(%arg0: i32) -> (i32, i32) {
    %c0_i32 = arith.constant 0 : i32
    %c0_i32_0 = arith.constant 0 : i32
    return %arg0, %c0_i32 : i32, i32
  }
  func.func @transform_1(%arg0: i32) -> (i32, i32) {
    %c0_i32 = arith.constant 0 : i32
    %c0_i32_0 = arith.constant 0 : i32
    %c0_i32_1 = arith.constant 0 : i32
    return %c0_i32, %c0_i32_0 : i32, i32
  }
  func.func @transform_2(%arg0: i32) -> (i32, i32) {
    %c0_i32 = arith.constant 0 : i32
    %c0_i32_0 = arith.constant 0 : i32
    %c0_i32_1 = arith.constant 0 : i32
    return %c0_i32, %c0_i32_0 : i32, i32
  }
  func.func @transform_3(%arg0: i32) -> (i32, i32) {
    %c0_i32 = arith.constant 0 : i32
    %c0_i32_0 = arith.constant 0 : i32
    return %arg0, %c0_i32 : i32, i32
  }
}

</mosaic_0001>

<bundles_post_ra>
// kernel: tpu_custom_call.1
= control target key start
LH: loop header
LB: loop body
LE: loop exit
PB: predicated region body
PF: predicated region fallthrough
CT: control target
= control target key end

     0   :  { %8 = vsyncpa [#allocation3], 0  ;;  %s408_s0 = inlined_call_operand.hbm [shape: bf16[16,16], index: 0, kind: input, shape index: {}]   ;;  %s409_s1 = inlined_call_operand.hbm [shape: bf16[16,512], index: 1, kind: input, shape index: {}]   ;;  %s410_s2 = inlined_call_operand.hbm [shape: f32[1,512], index: 2, kind: input, shape index: {}]   ;;  %s411_s3 = inlined_call_operand.hbm [shape: bf16[16,512], index: 3, kind: output, shape index: {}]  }
   0x1   :  { %9 = vsyncpa [#allocation6], 0 }
   0x2   :  { %10 = vsyncpa [#allocation4], 0  ;;  %s361_s12 = smov [#allocation5]  }
   0x3   :  { %s28_s13 = sshll.u32 %s361_s12, 4  ;;  %s29_s13 = int_to_ptr.vmem [resolvable:$true] %s28_s13 }
   0x4   :  { %s283_s14 = scalar_lea.vmem %s29_s13, 512  ;;  %p288_p1 = scmp.lt.s32.totalorder %s29_s13, %s29_s13 }
   0x5   :  { %p284_p0 = scmp.ne.s32.totalorder %s29_s13, %s283_s14  ;;  %p289_p2 = scmp.lt.s32.totalorder %s283_s14, %s283_s14 }
   0x7   :  { %p290_p3 = por %p289_p2, %p288_p1 }
   0x9   :  { %p291_p4 = pnand %p290_p3, %p284_p0 }
   0xb   :  { %294 = shalt.err (!%p291_p4)
}
   0xc   :  { %s362_s15 = smov 256   ;;  %s363_s16 = smov 16  }
   0xd   :  { %34 = dma.hbm_to_vmem [thread:$0]  %s409_s1, 512, %s29_s13, [#allocation6], %s362_s15, %s362_s15, %s363_s16  }
   0xe   :  { %s364_s19 = smov [#allocation2]  }
   0xf   :  { %s16_s20 = sshll.u32 %s364_s19, 4  ;;  %s17_s20 = int_to_ptr.vmem [resolvable:$true] %s16_s20 }
  0x10   :  { %s303_s21 = scalar_lea.vmem %s17_s20, 128  ;;  %p308_p6 = scmp.lt.s32.totalorder %s17_s20, %s17_s20 }
  0x11   :  { %p304_p5 = scmp.ne.s32.totalorder %s17_s20, %s303_s21  ;;  %p309_p7 = scmp.lt.s32.totalorder %s303_s21, %s303_s21 }
  0x13   :  { %p310_p8 = por %p309_p7, %p308_p6 }
  0x15   :  { %p311_p9 = pnand %p310_p8, %p304_p5 }
  0x17   :  { %314 = shalt.err (!%p311_p9)
}
  0x18   :  { %s365_s22 = smov 64   ;;  %s366_s23 = smov 4  }
  0x19   :  { %22 = dma.hbm_to_vmem [thread:$0]  %s408_s0, 128, %s17_s20, [#allocation3], %s365_s22, %s365_s22, %s366_s23  }
  0x1a   :  { %s367_s26 = smov [#allocation7]  }
  0x1b   :  { %s41_s27 = sshll.u32 %s367_s26, 4  ;;  %s42_s27 = int_to_ptr.vmem [resolvable:$true] %s41_s27 }
  0x1c   :  { %s323_s1 = scalar_lea.vmem %s42_s27, 64  ;;  %p328_p11 = scmp.lt.s32.totalorder %s42_s27, %s42_s27 }
  0x1d   :  { %p324_p10 = scmp.ne.s32.totalorder %s42_s27, %s323_s1  ;;  %p329_p12 = scmp.lt.s32.totalorder %s323_s1, %s323_s1 }
  0x1f   :  { %p330_p13 = por %p329_p12, %p328_p11 }
  0x21   :  { %p331_p0 = pnand %p330_p13, %p324_p10 }
  0x23   :  { %334 = shalt.err (!%p331_p0)
}
  0x24   :  { %44 = dma.hbm_to_vmem [thread:$0]  %s410_s2, 64, %s42_s27, [#allocation6]  }
  0x25   :  { %355 = dma.done.wait [#allocation3], 128  }
  0x26   :  { %356 = vsyncadd [#allocation3], 4294967168 }
  0x27   :  { %357 = dma.done.wait [#allocation6], 576  }
  0x28   :  { %358 = vsyncadd [#allocation6], 4294966720  ;;  %v368_v0 = vmov 0   ;;  %v268_v1 = vld [vmem:[#allocation5 + $0x4] ss:$16 sps:$4 sm:$0xff]   ;;  %v274_v5 = vld [vmem:[#allocation2] sm:$0xff]   ;;  %v63_v6 = vlaneseq }
  0x29   :  { %144 = vmatprep.mubr.bf16.mxu0 %v368_v0  ;;  %187 = vmatprep.mubr.bf16.mxu1 %v368_v0  ;;  %v270_v2 = vld [vmem:[#allocation5 + $0xc] ss:$16 sps:$4 sm:$0xff]   ;;  %v272_v3 = vld [vmem:[#allocation5] ss:$16 sps:$4 sm:$0xff]   ;;  %v273_v4 = vld [vmem:[#allocation5 + $0x8] ss:$16 sps:$4 sm:$0xff]  }
  0x2a   :  { %126 = vmatprep.subr.bf16.mxu0 %v268_v1  ;;  %169 = vmatprep.subr.bf16.mxu1 %v270_v2  ;;  %vm108_vm0 = vcmask 130048   ;;  %v64_v7 = vshrl.u32 %v63_v6, 7  ;;  %v61_v12 = vld [vmem:[#allocation7] sm:$0xf]  ;;  %s369_s0 = smov [#allocation8]  }
  0x2b   :  { %127 = vmatpush1.bf16.msra.mxu0 %v272_v3  ;;  %170 = vmatpush1.bf16.msra.mxu1 %v273_v4  ;;  %s231_s2 = sshll.u32 %s369_s0, 4  ;;  %s232_s2 = int_to_ptr.vmem [resolvable:$true] %s231_s2 }
  0x2c   :  { %v65_v8 = vsub.s32 0, %v64_v7  ;;  %v73_v9 = vsub.s32 2, %v64_v7  ;;  %v69_v10 = vsub.s32 1, %v64_v7  ;;  %v77_v11 = vsub.s32 3, %v64_v7  ;;  %s335_s30 = scalar_lea.vmem %s232_s2, 512  ;;  %p340_p2 = scmp.lt.s32.totalorder %s232_s2, %s232_s2 }
  0x2d   :  { %p336_p1 = scmp.ne.s32.totalorder %s232_s2, %s335_s30  ;;  %p341_p3 = scmp.lt.s32.totalorder %s335_s30, %s335_s30 }
  0x2e   :  { %249 = vmatmul.mubr.msk.bf16.vlgmr.msra.gmra.mxu0 %vm108_vm0, %v274_v5  ;;  %250 = vmatmul.mubr.msk.bf16.vlgmr.msra.gmra.mxu1 %vm108_vm0, %v274_v5  ;;  %v66_v13 = vrot.slane %v61_v12, %v65_v8  ;;  %v74_v14 = vrot.slane %v61_v12, %v73_v9  ;;  %v70_v15 = vrot.slane %v61_v12, %v69_v10 }
  0x2f   :  { %v78_v16 = vrot.slane %v61_v12, %v77_v11  ;;  %p342_p4 = por %p341_p3, %p340_p2 }
  0x31   :  { %p343_p5 = pnand %p342_p4, %p336_p1 }
  0xee   :  { %v146_v17 = vpop.f32.mrf.mxu0  ;;  %v189_v18 = vpop.f32.mrf.mxu1 }
  0xef   :  { %v147_v21 = vadd.f32 %v146_v17, %v66_v13  ;;  %v190_v22 = vadd.f32 %v189_v18, %v74_v14 }
  0xf0   :  { %v148_v19 = vpop.f32.mrf.mxu0  ;;  %v191_v20 = vpop.f32.mrf.mxu1 }
  0xf1   :  { %v149_v23 = vadd.f32 %v148_v19, %v70_v15  ;;  %v192_v24 = vadd.f32 %v191_v20, %v78_v16 }
  0xf2   :  { %v150_v25 = vpop.f32.mrf.mxu0  ;;  %v193_v26 = vpop.f32.mrf.mxu1 }
  0xf3   :  { %v255_v27 = vpack.c.bf16 %v149_v23, %v147_v21  ;;  %v256_v28 = vpack.c.bf16 %v192_v24, %v190_v22  ;;  %v151_v31 = vadd.f32 %v150_v25, %v66_v13  ;;  %v194_v32 = vadd.f32 %v193_v26, %v74_v14 }
  0xf4   :  { %v152_v29 = vpop.f32.mrf.mxu0  ;;  %v195_v30 = vpop.f32.mrf.mxu1 }
  0xf5   :  { %222 = vst [vmem:[#allocation8] sm:$0xff] %v255_v27  ;;  %223 = vst [vmem:[#allocation8 + $0x8] sm:$0xff] %v256_v28  ;;  %v153_v33 = vadd.f32 %v152_v29, %v70_v15  ;;  %v196_v34 = vadd.f32 %v195_v30, %v78_v16 }
  0xf7   :  { %v257_v35 = vpack.c.bf16 %v153_v33, %v151_v31  ;;  %v258_v36 = vpack.c.bf16 %v196_v34, %v194_v32 }
  0xf9   :  { %224 = vst [vmem:[#allocation8 + $0x10] sm:$0xff] %v257_v35  ;;  %225 = vst [vmem:[#allocation8 + $0x18] sm:$0xff] %v258_v36 }
  0xfa   :  { %346 = shalt.err (!%p343_p5)
}
  0xfb   :  { %237 = dma.vmem_to_hbm [thread:$0]  %s232_s2, 512, %s411_s3, [#allocation4], %s362_s15, %s362_s15, %s363_s16  }
  0xfc   :  { %359 = dma.done.wait [#allocation4], 512  }
  0xfd   :  { %360 = vsyncadd [#allocation4], 4294966784 }
  0xfe   :  { %241 = vsyncpa [#allocation3], 1 }
  0xff   :  { %242 = vsyncpa [#allocation6], 1 }
 0x100   :  { %243 = vsyncpa [#allocation4], 1 }

</bundles_post_ra>
